<compile_context>
chip_gen: v7x
topology: tpu7x:2x2x1
jax: 0.10.0
libtpu: 0.0.40
codegen_flags: <defaults>
</compile_context>

<pallas_src>
import functools
import math

import jax
import jax.numpy as jnp
from jax.experimental import pallas as pl
from jax.experimental.pallas import tpu as pltpu


# ----------------------------------------------------------------------------
# helpers
# ----------------------------------------------------------------------------
def _round_up(x: int, m: int) -> int:
    return -(-x // m) * m


def _sort_key(c, finite_inputs: bool):
    """Comparable key in (near-)native dtype; NaN -> +inf so the first NaN in
    a row wins (torch.argmax treats NaN as the maximum)."""
    if jnp.issubdtype(c.dtype, jnp.floating):
        if c.dtype in (jnp.dtype(jnp.float32), jnp.dtype(jnp.bfloat16)):
            k = c                      # bf16 VALU on v6e/v7x: no upcast needed
        else:
            k = c.astype(jnp.float32)  # f16 / f64 compared in f32
        if finite_inputs:
            return k
        return jnp.where(jnp.isnan(k), jnp.inf, k)
    # TODO(synk): int64 / unsigned inputs are compared after an int32 cast.
    return c.astype(jnp.int32)


def _pick_block_rows(rows: int, width: int, in_itemsize: int,
                     *, target_bytes: int = 4 << 20, min_grid: int = 4) -> int:
    """Multiple-of-8 block height targeting ~target_bytes of (input + f32
    output) per block while keeping >= min_grid grid steps (>= 2 per v7x
    TensorCore) whenever `rows` allows it.  Used with a cdiv grid, so it does
    NOT need to divide `rows`."""
    bytes_per_row = width * (in_itemsize + 4)          # input + f32 output
    bm = max(8, (target_bytes // bytes_per_row) // 8 * 8)
    bm = min(bm, max(8, _round_up(pl.cdiv(rows, min_grid), 8)))
    return bm


def _check_block_rows(bm: int, rows: int):
    if not (0 < bm <= rows and (bm % 8 == 0 or bm == rows)):
        raise ValueError(
            f"block_rows={bm} must be a positive multiple of 8 (or the full "
            f"extent) and <= {rows}")


# ----------------------------------------------------------------------------
# kernel 1: lane-dense packed layout (D < 128)
#   coords (B, D) viewed row-major as (B/R, R*D): each packed row holds R
#   complete coordinate rows in groups of D consecutive lanes.
#   winner[i] = 1  iff  key[i] >= every LATER element of its group
#                  and  key[i] >  every EARLIER element of its group
#   (first-occurrence argmax), evaluated with 2*(D-1) static lane rolls.
#   Wrap-around lanes from neighbouring groups are masked via `pos`
#   (lane index mod D), broadcast to the full tile ONCE before the loop.
# ----------------------------------------------------------------------------
def _packed_kernel(pos_ref, coords_ref, out_ref, *, dim: int,
                   finite_inputs: bool):
    key = _sort_key(coords_ref[...], finite_inputs)    # (bm, width)
    width = key.shape[-1]
    # Hoisted: JAX does not CSE broadcast_in_dim, so letting the per-s ORs
    # broadcast (1,width) masks would re-materialize this 2*(D-1) times.
    pos = jnp.broadcast_to(pos_ref[...], key.shape)    # (bm, width) int32
    winner = None
    for s in range(1, dim):
        later = pltpu.roll(key, width - s, 1)          # value of lane (i + s)
        earlier = pltpu.roll(key, s, 1)                # value of lane (i - s)
        ok = (((pos >= dim - s) | (key >= later)) &
              ((pos < s) | (key > earlier)))
        winner = ok if winner is None else winner & ok
    out_ref[...] = winner.astype(out_ref.dtype)


def _packed_forward(coords, dim, R, block_rows, finite_inputs):
    B = coords.shape[0]
    width = R * dim
    rows = pl.cdiv(B, R)
    b_pad = rows * R
    if b_pad != B:
        # One extra pass over the input, but it keeps the lane-dense layout
        # and unmasked stores -- far cheaper than the lane-sparse fallback.
        coords = jnp.pad(coords, ((0, b_pad - B), (0, 0)))
    packed = coords.reshape(rows, width)               # row-major view: free
    if rows < 8:
        bm = rows                                      # full-extent block
    else:
        bm = block_rows or _pick_block_rows(rows, width, coords.dtype.itemsize)
        _check_block_rows(bm, rows)
    grid = pl.cdiv(rows, bm)
    pos = jnp.tile(jnp.arange(dim, dtype=jnp.int32), R)[None, :]   # (1, width)

    out = pl.pallas_call(
        functools.partial(_packed_kernel, dim=dim, finite_inputs=finite_inputs),
        out_shape=jax.ShapeDtypeStruct((rows, width), jnp.float32),
        grid_spec=pltpu.PrefetchScalarGridSpec(
            num_scalar_prefetch=0,
            grid=(grid,),
            in_specs=[pl.BlockSpec((1, width), lambda i: (0, 0)),
                      pl.BlockSpec((bm, width), lambda i: (i, 0))],
            out_specs=pl.BlockSpec((bm, width), lambda i: (i, 0)),
        ),
        compiler_params=pltpu.CompilerParams(
            dimension_semantics=("parallel",)),
        cost_estimate=pl.CostEstimate(
            flops=0, transcendentals=0,
            bytes_accessed=b_pad * dim * (coords.dtype.itemsize + 4)),
    )(pos, packed)

    out = out.reshape(b_pad, dim)
    return out if b_pad == B else out[:B]


# ----------------------------------------------------------------------------
# kernel 2: row-wise layout (D >= 128, already lane-dense).
#   Per-row max, then min over the masked column iota gives the
#   first-occurrence argmax index.
# ----------------------------------------------------------------------------
def _rowwise_kernel(coords_ref, out_ref, *, finite_inputs: bool):
    key = _sort_key(coords_ref[...], finite_inputs)    # (bm, D)
    D = key.shape[-1]
    row_max = jnp.max(key, axis=1, keepdims=True)
    col = jax.lax.broadcasted_iota(jnp.int32, key.shape, 1)
    first_idx = jnp.min(jnp.where(key == row_max, col, D), axis=1,
                        keepdims=True)
    out_ref[...] = (col == first_idx).astype(out_ref.dtype)


def _rowwise_forward(coords, dim, block_rows, finite_inputs):
    B = coords.shape[0]
    if B < 8:
        bm = B                                          # full-extent block
    else:
        bm = block_rows or _pick_block_rows(B, dim, coords.dtype.itemsize)
        _check_block_rows(bm, B)
    grid = pl.cdiv(B, bm)
    return pl.pallas_call(
        functools.partial(_rowwise_kernel, finite_inputs=finite_inputs),
        out_shape=jax.ShapeDtypeStruct((B, dim), jnp.float32),
        grid_spec=pltpu.PrefetchScalarGridSpec(
            num_scalar_prefetch=0,
            grid=(grid,),
            in_specs=[pl.BlockSpec((bm, dim), lambda i: (i, 0))],
            out_specs=pl.BlockSpec((bm, dim), lambda i: (i, 0)),
        ),
        compiler_params=pltpu.CompilerParams(
            dimension_semantics=("parallel",)),
        cost_estimate=pl.CostEstimate(
            flops=0, transcendentals=0,
            bytes_accessed=B * dim * (coords.dtype.itemsize + 4)),
    )(coords)


# ----------------------------------------------------------------------------
# public entry point
# ----------------------------------------------------------------------------
_MIN_PALLAS_BYTES = 256 * 1024     # below this, fused XLA argmax+one_hot wins
_PACK_DIM_LIMIT = 128              # dims >= 128 are already lane-dense


def choose_first_agent_forward(coords: jax.Array, dimension: int, *,
                               block_rows: int | None = None,
                               force_pallas: bool = False,
                               finite_inputs: bool = False) -> jax.Array:
    """one_hot(argmax(coords, axis=1), dimension) as float32 (ties -> first)."""
    B, D = coords.shape
    if D != dimension:
        raise ValueError("coords last dim must equal module dimension")
    if D == 1:
        return jnp.ones((B, 1), jnp.float32)

    nbytes = B * D * coords.dtype.itemsize
    if not force_pallas and nbytes < _MIN_PALLAS_BYTES:
        # Fast path: pallas_call fixed overhead dwarfs toy-sized problems.
        return jax.nn.one_hot(jnp.argmax(coords, axis=1), D, dtype=jnp.float32)

    if D < _PACK_DIM_LIMIT:
        R = math.lcm(D, 128) // D
        return _packed_forward(coords, D, R, block_rows, finite_inputs)
    return _rowwise_forward(coords, D, block_rows, finite_inputs)


class ChooseFirstAgentModule:
    """JAX/Pallas port of hironaka's ChooseFirstAgentModule (no parameters)."""

    def __init__(self, dimension: int, max_num_points: int, device=None,
                 finite_inputs: bool = False):
        self.dimension = dimension
        self.max_num_points = max_num_points   # unused in forward (as in torch)
        self.device = device                   # placement handled by JAX
        self.finite_inputs = finite_inputs

    def __call__(self, x: dict) -> jax.Array:
        return choose_first_agent_forward(x["coords"], self.dimension,
                                          finite_inputs=self.finite_inputs)


if __name__ == "__main__":
    key = jax.random.PRNGKey(0)
    k1, k2, k3, k4, k5, k6 = jax.random.split(key, 6)

    def ref_onehot(c, d):
        return jax.nn.one_hot(jnp.argmax(c, axis=1), d, dtype=jnp.float32)

    # 1) toy module shape (batch=8, dimension=4) -> plain-JAX fast path.
    batch, dimension, max_num_points = 8, 4, 8
    coords_small = jax.random.uniform(k1, (batch, dimension), dtype=jnp.float32)
    module = ChooseFirstAgentModule(dimension, max_num_points)
    out_small = jax.block_until_ready(module({"coords": coords_small}))
    assert out_small.shape == (batch, dimension)
    assert out_small.dtype == jnp.float32
    assert bool(jnp.all(out_small == ref_onehot(coords_small, dimension)))

    # 2) packed Pallas kernel, D=4 (R=32), floats with many exact ties
    #    (first-occurrence), B % R == 0 -> no padding; grid of 4.
    B2, D2 = 1024, 4
    c2 = jax.random.randint(k2, (B2, D2), 0, 3).astype(jnp.float32)
    out2 = jax.block_until_ready(
        choose_first_agent_forward(c2, D2, force_pallas=True))
    assert bool(jnp.all(out2 == ref_onehot(c2, D2)))

    # 3) packed Pallas kernel, D=3 (R=128), native int32, ragged cdiv grid
    #    (rows=10, bm=8 -> masked stores only in the final block).
    B3, D3 = 1280, 3
    c3 = jax.random.randint(k3, (B3, D3), -5, 6, dtype=jnp.int32)
    out3 = jax.block_until_ready(
        choose_first_agent_forward(c3, D3, force_pallas=True))
    assert bool(jnp.all(out3 == ref_onehot(c3, D3)))

    # 4) packed Pallas kernel with batch padding (B % R != 0) + finite_inputs.
    B4, D4 = 1000, 4
    c4 = jax.random.uniform(k4, (B4, D4), dtype=jnp.float32)
    out4 = jax.block_until_ready(
        choose_first_agent_forward(c4, D4, force_pallas=True,
                                   finite_inputs=True))
    assert bool(jnp.all(out4 == ref_onehot(c4, D4)))

    # 5) packed Pallas kernel, bf16 input (comparison key stays bf16).
    B5, D5 = 512, 4
    c5 = jax.random.uniform(k5, (B5, D5), dtype=jnp.float32).astype(jnp.bfloat16)
    out5 = jax.block_until_ready(
        choose_first_agent_forward(c5, D5, force_pallas=True))
    assert bool(jnp.all(out5 == ref_onehot(c5, D5)))

    # 6) row-wise Pallas kernel (large, already lane-dense dimension).
    B6, D6 = 64, 256
    c6 = jax.random.uniform(k6, (B6, D6), dtype=jnp.float32)
    out6 = jax.block_until_ready(
        choose_first_agent_forward(c6, D6, force_pallas=True))
    assert bool(jnp.all(out6 == ref_onehot(c6, D6)))

    print("KERNEL_OK")
</pallas_src>

<mosaic_0001>
module attributes {stable_mosaic.version = 11 : i64} {
  func.func @_packed_kernel(%arg0: i32, %arg1: memref<1x128xi32, #tpu.memory_space<vmem>>, %arg2: memref<8x128xf32, #tpu.memory_space<vmem>>, %arg3: memref<8x128xf32, #tpu.memory_space<vmem>>) attributes {dimension_semantics = [#tpu.dimension_semantics<parallel>], iteration_bounds = array<i64: 4>, scalar_prefetch = 0 : i64, scratch_operands = 0 : i64, tpu.core_type = #tpu.core_type<tc>, window_params = [{pipeline_mode = #tpu.pipeline_mode<synchronous>, transform_indices = @transform_0, window_bounds = array<i64: 1, 128>}, {transform_indices = @transform_1, window_bounds = array<i64: 8, 128>}, {transform_indices = @transform_2, window_bounds = array<i64: 8, 128>}]} {
    %c0 = arith.constant 0 : index
    %c0_0 = arith.constant 0 : index
    %0 = vector.load %arg2[%c0, %c0_0] : memref<8x128xf32, #tpu.memory_space<vmem>>, vector<8x128xf32>
    %1 = arith.cmpf one, %0, %0 : vector<8x128xf32>
    %cst = arith.constant 0x7F800000 : f32
    %2 = vector.broadcast %cst : f32 to vector<8x128xf32>
    %3 = arith.select %1, %2, %0 : vector<8x128xi1>, vector<8x128xf32>
    %c0_1 = arith.constant 0 : index
    %c0_2 = arith.constant 0 : index
    %4 = vector.load %arg1[%c0_1, %c0_2] : memref<1x128xi32, #tpu.memory_space<vmem>>, vector<1x128xi32>
    %5 = vector.shape_cast %4 : vector<1x128xi32> to vector<1x128xi32>
    %6 = vector.broadcast %5 : vector<1x128xi32> to vector<8x128xi32>
    %c127_i32 = arith.constant 127 : i32
    %7 = tpu.dynamic_rotate %3 by %c127_i32 dim 1 : vector<8x128xf32>, i32 -> vector<8x128xf32>
    %c1_i32 = arith.constant 1 : i32
    %8 = tpu.dynamic_rotate %3 by %c1_i32 dim 1 : vector<8x128xf32>, i32 -> vector<8x128xf32>
    %c3_i32 = arith.constant 3 : i32
    %9 = vector.broadcast %c3_i32 : i32 to vector<8x128xi32>
    %10 = arith.cmpi sge, %6, %9 : vector<8x128xi32>
    %11 = arith.cmpf oge, %3, %7 : vector<8x128xf32>
    %12 = arith.ori %10, %11 : vector<8x128xi1>
    %c1_i32_3 = arith.constant 1 : i32
    %13 = vector.broadcast %c1_i32_3 : i32 to vector<8x128xi32>
    %14 = arith.cmpi slt, %6, %13 : vector<8x128xi32>
    %15 = arith.cmpf ogt, %3, %8 : vector<8x128xf32>
    %16 = arith.ori %14, %15 : vector<8x128xi1>
    %17 = arith.andi %12, %16 : vector<8x128xi1>
    %c126_i32 = arith.constant 126 : i32
    %18 = tpu.dynamic_rotate %3 by %c126_i32 dim 1 : vector<8x128xf32>, i32 -> vector<8x128xf32>
    %c2_i32 = arith.constant 2 : i32
    %19 = tpu.dynamic_rotate %3 by %c2_i32 dim 1 : vector<8x128xf32>, i32 -> vector<8x128xf32>
    %c2_i32_4 = arith.constant 2 : i32
    %20 = vector.broadcast %c2_i32_4 : i32 to vector<8x128xi32>
    %21 = arith.cmpi sge, %6, %20 : vector<8x128xi32>
    %22 = arith.cmpf oge, %3, %18 : vector<8x128xf32>
    %23 = arith.ori %21, %22 : vector<8x128xi1>
    %c2_i32_5 = arith.constant 2 : i32
    %24 = vector.broadcast %c2_i32_5 : i32 to vector<8x128xi32>
    %25 = arith.cmpi slt, %6, %24 : vector<8x128xi32>
    %26 = arith.cmpf ogt, %3, %19 : vector<8x128xf32>
    %27 = arith.ori %25, %26 : vector<8x128xi1>
    %28 = arith.andi %23, %27 : vector<8x128xi1>
    %29 = arith.andi %17, %28 : vector<8x128xi1>
    %c125_i32 = arith.constant 125 : i32
    %30 = tpu.dynamic_rotate %3 by %c125_i32 dim 1 : vector<8x128xf32>, i32 -> vector<8x128xf32>
    %c3_i32_6 = arith.constant 3 : i32
    %31 = tpu.dynamic_rotate %3 by %c3_i32_6 dim 1 : vector<8x128xf32>, i32 -> vector<8x128xf32>
    %c1_i32_7 = arith.constant 1 : i32
    %32 = vector.broadcast %c1_i32_7 : i32 to vector<8x128xi32>
    %33 = arith.cmpi sge, %6, %32 : vector<8x128xi32>
    %34 = arith.cmpf oge, %3, %30 : vector<8x128xf32>
    %35 = arith.ori %33, %34 : vector<8x128xi1>
    %c3_i32_8 = arith.constant 3 : i32
    %36 = vector.broadcast %c3_i32_8 : i32 to vector<8x128xi32>
    %37 = arith.cmpi slt, %6, %36 : vector<8x128xi32>
    %38 = arith.cmpf ogt, %3, %31 : vector<8x128xf32>
    %39 = arith.ori %37, %38 : vector<8x128xi1>
    %40 = arith.andi %35, %39 : vector<8x128xi1>
    %41 = arith.andi %29, %40 : vector<8x128xi1>
    %42 = arith.extui %41 : vector<8x128xi1> to vector<8x128xi32>
    %43 = arith.sitofp %42 : vector<8x128xi32> to vector<8x128xf32>
    %c0_9 = arith.constant 0 : index
    %c0_10 = arith.constant 0 : index
    %44 = vector.load %arg3[%c0_9, %c0_10] : memref<8x128xf32, #tpu.memory_space<vmem>>, vector<8x128xf32>
    tpu.vector_store %arg3[%c0_9, %c0_10], %43 {strides = array<i32>} : memref<8x128xf32, #tpu.memory_space<vmem>>, vector<8x128xf32>,
    return
  }
  func.func @transform_0(%arg0: i32) -> (i32, i32) {
    %c0_i32 = arith.constant 0 : i32
    %c0_i32_0 = arith.constant 0 : i32
    %c0_i32_1 = arith.constant 0 : i32
    return %c0_i32, %c0_i32_0 : i32, i32
  }
  func.func @transform_1(%arg0: i32) -> (i32, i32) {
    %c0_i32 = arith.constant 0 : i32
    %c0_i32_0 = arith.constant 0 : i32
    return %arg0, %c0_i32 : i32, i32
  }
  func.func @transform_2(%arg0: i32) -> (i32, i32) {
    %c0_i32 = arith.constant 0 : i32
    %c0_i32_0 = arith.constant 0 : i32
    return %arg0, %c0_i32 : i32, i32
  }
}

</mosaic_0001>

<bundles_post_ra>
// kernel: tpu_custom_call.1
= control target key start
LH: loop header
LB: loop body
LE: loop exit
PB: predicated region body
PF: predicated region fallthrough
CT: control target
= control target key end

     0   :  { %7 = vsyncpa [#allocation3], 0  ;;  %s764_s0 = inlined_call_operand.hbm [shape: s32[1,128], index: 0, kind: input, shape index: {}]   ;;  %s765_s1 = inlined_call_operand.hbm [shape: f32[32,128], index: 1, kind: input, shape index: {}]   ;;  %s766_s2 = inlined_call_operand.hbm [shape: f32[32,128], index: 2, kind: output, shape index: {}]  }
   0x1   :  { %8 = vsyncpa [#allocation6], 0 }
   0x2   :  { %10 = vsyncpa [#allocation6 + $0x1], 0 }
   0x3   :  { %11 = vsyncpa [#allocation4], 0 }
   0x4   :  { %13 = vsyncpa [#allocation4 + $0x1], 0  ;;  %s549_s9 = smov 0   ;;  %s551_s10 = smov 0  }
   0x5   :  { %s553_s11 = smov 0   ;;  %s555_s12 = smov 0  }
   0x6 LB: > { %s570_s13 = sadd.s32 4294967295, %s522_s12   ;;  %s314_s14 = sadd.s32 4294967294, %s522_s12   ;;  %s522_s12 = sphi %s555_s12, %s793_s12   ;;  %s518_s11 = sphi %s553_s11, %s792_s11   ;;  %s514_s10 = sphi %s551_s10, %s791_s10   ;;  %s510_s9 = sphi %s549_s9, %s790_s9  }
   0x7   : > { %p60_p0 = scmp.ne.s32.totalorder %s514_s10, %s510_s9  ;;  %p767_p1 = scmp.eq.s32.totalorder %s570_s13, 0 }
   0x8   : > { %p90_p3 = scmp.eq.s32.totalorder %s314_s14, 3  ;;  %p315_p5 = scmp.ge.s32.totalorder %s522_s12, 1 }
   0x9   : > { %p579_p4 = por %p767_p1, %p60_p0  ;;  %p97_p7 = scmp.lt.s32.totalorder %s522_s12, 5 }
   0xa   : > { %p584_p6 = por %p90_p3, %p60_p0  ;;  %s524_s18 = smov [#allocation2]  }
   0xb   : > { %s770_s15 = scalar_select %p579_p4, 1, 0 }
   0xc   : > { %s771_s16 = scalar_select %p584_p6, 1, 0 }
   0xd   : > { %p589_p8 = pnand %p315_p5, %p97_p7  ;;  %s110_s19 = sshll.u32 %s524_s18, 4  ;;  %s111_s19 = int_to_ptr.vmem [resolvable:$true] %s110_s19 }
   0xe   : > { %s596_s20 = sadd.s32 1, %s522_s12   ;;  %s47_s24 = sadd.s32 1, %s518_s11 }
   0xf   : > { %s772_s17 = scalar_select %p589_p8, 1, 0 }
  0x10   : > { %p338_p9 = pneg %p589_p8  ;;  %s44_s22 = ssub.s32 %s522_s12, %s596_s20 }
  0x11   : > { %p606_p11 = scmp.eq.s32.totalorder %s44_s22, 0  ;;  %s394_s27 = scalar_lea.hbm %s764_s0, 16 }
  0x12   : > { %p600_p10 = pnand %p338_p9, %p767_p1  ;;  %p395_p13 = scmp.ne.s32.totalorder %s764_s0, %s394_s27 }
  0x13   : > { %s774_s23 = scalar_select %p606_p11, 1, 0 }
  0x14   : > { %p396_p0 = pneg %p600_p10  ;;  %p401_p7 = scmp.lt.u32.totalorder %s394_s27, %s764_s0 }
  0x16   : > { %p397_p3 = pnand %p396_p0, %p395_p13 }
  0x18   : > { %p398_p5 = pneg %p397_p3 }
  0x1a   : > { %p403_p9 = pnand %p401_p7, %p398_p5 }
  0x1c   : > { %406 = shalt.err (!%p403_p9)
}
  0x1d   : > { %s407_s4 = scalar_lea.vmem %s111_s19, 16  ;;  %s414_s5 = scalar_lea.vmem %s111_s19, 32 }
  0x1e   : > { %p408_p1 = scmp.ne.s32.totalorder %s111_s19, %s407_s4  ;;  %p415_p6 = scmp.lt.s32.totalorder %s111_s19, %s111_s19 }
  0x1f   : > { %p416_p4 = scmp.lt.s32.totalorder %s414_s5, %s407_s4 }
  0x20   : > { %p410_p2 = pnand %p408_p1, %p396_p0 }
  0x21   : > { %p417_p8 = por %p416_p4, %p415_p6 }
  0x22   : > { %p411_p12 = pneg %p410_p2 }
  0x24   : > { %p418_p11 = pnand %p417_p8, %p411_p12 }
  0x26   : > { %421 = shalt.err (!%p418_p11)
}
  0x27   : > { %341 = dma.hbm_to_vmem [thread:$0]  (!%p600_p10), %s764_s0, 16, %s111_s19, [#allocation3]  }
  0x28   : > { %p775_p1 = scmp.ne.s32.totalorder %s774_s23, 0  ;;  %p55_p2 = scmp.eq.s32.totalorder %s522_s12, 0 }
  0x29   : > { %p776_p4 = scmp.ne.s32.totalorder %s518_s11, %s514_s10  ;;  %p777_p6 = scmp.eq.s32.totalorder %s570_s13, 3 }
  0x2a   : > { %s632_s8 = scalar_select %p775_p1, %s518_s11, %s47_s24  }
  0x2b   : > { %p640_p8 = por %p777_p6, %p776_p4  ;;  %p351_p11 = scmp.lt.s32.totalorder %s522_s12, 4 }
  0x2c   : > { %s121_s18 = sand.u32 1, %s518_s11   ;;  %p779_p12 = pmov %p776_p4 }
  0x2d   : > { %s318_s21 = sshll.u32 %s121_s18, 3  ;;  %s319_s22 = sshll.u32 %s522_s12, 7 }
  0x2e   : > { %p56_p13 = por %p55_p2, %p779_p12  ;;  %s653_s19 = scalar_lea.hbm %s765_s1, %s319_s22 }
  0x2f   : > { %s125_s23 = scalar_lea.vmem [#allocation5], %s318_s21  ;;  %s122_s28 = scalar_lea.sflag [#allocation6], %s121_s18 }
  0x30   : > { %s132_s24 = sshll.u32 %s125_s23, 4  ;;  %p655_p10 = pnand %p351_p11, %p56_p13  ;;  %s659_s24 = int_to_ptr.vmem [resolvable:$true] %s132_s24 }
  0x31   : > { %s422_s29 = scalar_lea.hbm %s653_s19, 128  ;;  %s427_s4 = scalar_lea.hbm %s765_s1, 512 }
  0x32   : > { %p423_p0 = scmp.ne.s32.totalorder %s653_s19, %s422_s29  ;;  %p424_p3 = pneg %p655_p10 }
  0x33   : > { %p428_p9 = scmp.lt.u32.totalorder %s653_s19, %s765_s1  ;;  %p429_p1 = scmp.lt.u32.totalorder %s427_s4, %s422_s29 }
  0x34   : > { %p425_p5 = pnand %p424_p3, %p423_p0  ;;  %p431_p4 = scmp.lt.u32.totalorder %s422_s29, %s653_s19 }
  0x35   : > { %p430_p2 = por %p429_p1, %p428_p9 }
  0x36   : > { %p426_p7 = pneg %p425_p5 }
  0x37   : > { %p432_p6 = por %p431_p4, %p430_p2 }
  0x39   : > { %p433_p11 = pnand %p432_p6, %p426_p7 }
  0x3b   : > { %436 = shalt.err (!%p433_p11)
}
  0x3c   : > { %s437_s7 = scalar_lea.vmem %s659_s24, 128  ;;  %s525_s18 = smov [#allocation5]  }
  0x3d   : > { %p438_p12 = scmp.ne.s32.totalorder %s659_s24, %s437_s7  ;;  %s442_s21 = sshll.u32 %s525_s18, 4  ;;  %s443_s21 = int_to_ptr.vmem [resolvable:$false] %s442_s21 }
  0x3e   : > { %s444_s22 = scalar_lea.vmem %s443_s21, 256  ;;  %p445_p5 = scmp.lt.s32.totalorder %s659_s24, %s443_s21 }
  0x3f   : > { %p440_p13 = pnand %p438_p12, %p424_p3  ;;  %p446_p9 = scmp.lt.s32.totalorder %s444_s22, %s437_s7 }
  0x41   : > { %p441_p0 = pneg %p440_p13  ;;  %p447_p1 = por %p446_p9, %p445_p5 }
  0x43   : > { %p448_p2 = pnand %p447_p1, %p441_p0 }
  0x45   : > { %451 = shalt.err (!%p448_p2)
}
  0x46   : > { %345 = dma.hbm_to_vmem [thread:$0]  (!%p655_p10), %s653_s19, 128, %s659_s24, %s122_s28  }
  0x47   : > { %p781_p7 = scmp.ne.s32.totalorder %s772_s17, 0 }
  0x48   : > { %p782_p3 = scmp.eq.s32.totalorder (!%p781_p7), %s570_s13, 0 }
  0x49   : > { %141 = sbr.rel (%p781_p7) target bundleno = 232 (0xe8), region = 28 }
  0x50   : > { %497 = dma.done.wait (%p782_p3), [#allocation3], 16   ;;  %p783_p4 = pmov %p782_p3 }
  0x51   : > { %s693_s25 = sand.u32 1, %s514_s10   ;;  %p784_p10 = scmp.ne.s32.totalorder %s770_s15, 0 }
  0x52   : > { %499 = vsyncadd (%p783_p4), [#allocation3], 4294967280  ;;  %s322_s26 = sshll.u32 %s693_s25, 3  ;;  %s148_s23 = scalar_lea.sflag [#allocation6], %s693_s25 }
  0x53   : > { %s151_s19 = scalar_lea.vmem [#allocation5], %s322_s26 }
  0x54   : > { %501 = dma.done.wait (%p784_p10), %s148_s23, 128  }
  0x55   : > { %503 = vsyncadd (%p784_p10), %s148_s23, 4294967168  ;;  %v172_v0 = vld [vmem:[%s151_s19] sm:$0xff]  ;;  %s526_s17 = smov 126   ;;  %s527_s24 = smov 127   ;;  %v324_v2 = vld [vmem:[#allocation2] ss:$0 sm:$0xff] }
  0x56   : > { %vm173_vm0 = vcmp.ne.f32.partialorder %v172_v0, %v172_v0  ;;  %s528_s27 = smov 2   ;;  %s529_s28 = smov 1   ;;  %vm195_vm1 = vcmp.ge.s32.totalorder %v324_v2, 2  ;;  %vm184_vm3 = vcmp.ge.s32.totalorder %v324_v2, 3  ;;  %vm198_vm5 = vcmp.lt.s32.totalorder %v324_v2, 2 }
  0x57   : > { %v174_v1 = vsel %vm173_vm0, inf, %v172_v0  ;;  %s530_s29 = smov 3   ;;  %s531_s30 = smov 125   ;;  %vm187_vm9 = vcmp.lt.s32.totalorder %v324_v2, 1  ;;  %vm210_vm14 = vcmp.lt.s32.totalorder %v324_v2, 3  ;;  %v532_v11 = vmov 0.0  }
  0x58   : > { %191 = vrot.lane.b32.xlu1 %v174_v1, %s526_s17  ;;  %180 = vrot.lane.b32.xlu0 %v174_v1, %s527_s24  ;;  %s327_s15 = sshll.u32 %s570_s13, 7  ;;  %s171_s3 = scalar_lea.vmem [#allocation7], %s322_s26 }
  0x59   : > { %s232_s4 = sshll.u32 %s171_s3, 4  ;;  %s721_s7 = scalar_lea.hbm %s766_s2, %s327_s15  ;;  %s723_s4 = int_to_ptr.vmem [resolvable:$true] %s232_s4 }
  0x5a   : > { %s219_s13 = scalar_lea.sflag [#allocation4], %s693_s25  ;;  %s452_s18 = scalar_lea.vmem %s723_s4, 128 }
  0x5b   : > { %p453_p6 = scmp.ne.s32.totalorder %s723_s4, %s452_s18  ;;  %s533_s21 = smov [#allocation7]  }
  0x5c   : > { %193 = vrot.lane.b32.xlu1 %v174_v1, %s528_s27  ;;  %182 = vrot.lane.b32.xlu0 %v174_v1, %s529_s28  ;;  %s456_s22 = sshll.u32 %s533_s21, 4  ;;  %s457_s22 = int_to_ptr.vmem [resolvable:$false] %s456_s22 }
  0x5d   : > { %p454_p11 = pnand %p453_p6, %p640_p8  ;;  %s458_s26 = scalar_lea.vmem %s457_s22, 256 }
  0x5e   : > { %p459_p13 = scmp.lt.s32.totalorder %s723_s4, %s457_s22  ;;  %p460_p0 = scmp.lt.s32.totalorder %s458_s26, %s452_s18 }
  0x5f   : > { %p455_p12 = pneg %p454_p11 }
  0x60   : > { %205 = vrot.lane.b32.xlu1 %v174_v1, %s530_s29  ;;  %203 = vrot.lane.b32.xlu0 %v174_v1, %s531_s30  ;;  %p461_p5 = por %p460_p0, %p459_p13 }
  0x62   : > { %p462_p9 = pnand %p461_p5, %p455_p12 }
  0xca   : > { %v192_v3 = vpop.permute.xlu1 %191  ;;  %v181_v4 = vpop.permute.xlu0 %180 }
  0xcb   : > { %vm196_vm2 = vcmp.ge.f32.partialorder %v174_v1, %v192_v3  ;;  %vm185_vm4 = vcmp.ge.f32.partialorder %v174_v1, %v181_v4 }
  0xcc   : > { %vm703_vm6 = vmor %vm195_vm1, %vm196_vm2  ;;  %vm207_vm1 = vcmp.ge.s32.totalorder %v324_v2, 1 }
  0xcd   : > { %vm707_vm7 = vmor %vm184_vm3, %vm185_vm4 }
  0xce   : > { %v194_v6 = vpop.permute.xlu1 %193  ;;  %v183_v7 = vpop.permute.xlu0 %182 }
  0xcf   : > { %vm199_vm8 = vcmp.gt.f32.partialorder %v174_v1, %v194_v6  ;;  %vm188_vm10 = vcmp.gt.f32.partialorder %v174_v1, %v183_v7 }
  0xd0   : > { %vm200_vm11 = vmor %vm198_vm5, %vm199_vm8 }
  0xd1   : > { %vm201_vm12 = vmand %vm703_vm6, %vm200_vm11 }
  0xd2   : > { %vm189_vm13 = vmor %vm187_vm9, %vm188_vm10  ;;  %v206_v9 = vpop.permute.xlu1 %205  ;;  %v204_v10 = vpop.permute.xlu0 %203 }
  0xd3   : > { %vm190_vm15 = vmand %vm707_vm7, %vm189_vm13  ;;  %vm211_vm0 = vcmp.gt.f32.partialorder %v174_v1, %v206_v9  ;;  %vm208_vm2 = vcmp.ge.f32.partialorder %v174_v1, %v204_v10 }
  0xd4   : > { %vm202_vm3 = vmand %vm190_vm15, %vm201_vm12 }
  0xd5   : > { %vm212_vm4 = vmor %vm210_vm14, %vm211_vm0 }
  0xd6   : > { %vm209_vm5 = vmor %vm207_vm1, %vm208_vm2 }
  0xd7   : > { %vm213_vm6 = vmand %vm209_vm5, %vm212_vm4 }
  0xd8   : > { %vm214_vm8 = vmand %vm202_vm3, %vm213_vm6 }
  0xd9   : > { %v325_v12 = vsel %vm214_vm8, 1.0, %v532_v11 }
  0xda   : > { %217 = vst [vmem:[%s171_s3] sm:$0xff] %v325_v12 }
  0xdb   : > { %465 = shalt.err (!%p462_p9)
}
  0xdc   : > { %s466_s25 = scalar_lea.hbm %s721_s7, 128  ;;  %s470_s17 = scalar_lea.hbm %s766_s2, 512 }
  0xdd   : > { %p467_p1 = scmp.ne.s32.totalorder %s721_s7, %s466_s25  ;;  %p471_p3 = scmp.lt.u32.totalorder %s721_s7, %s766_s2 }
  0xde   : > { %p472_p4 = scmp.lt.u32.totalorder %s470_s17, %s466_s25  ;;  %p474_p6 = scmp.lt.u32.totalorder %s466_s25, %s721_s7 }
  0xdf   : > { %p468_p2 = pnand %p467_p1, %p640_p8 }
  0xe0   : > { %p473_p10 = por %p472_p4, %p471_p3 }
  0xe1   : > { %p469_p7 = pneg %p468_p2 }
  0xe2   : > { %p475_p11 = por %p474_p6, %p473_p10 }
  0xe4   : > { %p476_p12 = pnand %p475_p11, %p469_p7 }
  0xe6   : > { %479 = shalt.err (!%p476_p12)
}
  0xe7   : > { %336 = dma.vmem_to_hbm [thread:$0]  (%p640_p8), %s723_s4, 128, %s721_s7, %s219_s13  }
  0xe8 PF: > { %p353_p13 = scmp.ge.s32.totalorder %s522_s12, 2  ;;  %s244_s28 = sand.u32 1, %s510_s9  }
  0xe9   : > { %p789_p0 = scmp.ne.s32.totalorder %s771_s16, 0  ;;  %s245_s29 = scalar_lea.sflag [#allocation4], %s244_s28 }
  0xeb   : > { %p347_p5 = pnand %p353_p13, %p789_p0 }
  0xed   : > { %505 = dma.done.wait (!%p347_p5), %s245_s29, 128  }
  0xee   : > { %507 = vsyncadd (!%p347_p5), %s245_s29, 4294967168  ;;  %p16_p9 = scmp.ge.s32.totalorder %s596_s20, 6   ;;  %s790_s9 = smov %s514_s10 }
  0xef   : > { %s791_s10 = smov %s518_s11  ;;  %s792_s11 = smov %s632_s8 }
  0xf0   : > { %s793_s12 = smov %s596_s20  ;;  %18 = sbr.rel (!%p16_p9) target bundleno = 6 (0x6), region = 78 }
  0xf7   :  { %250 = vsyncpa [#allocation3], 1 }
  0xf8   :  { %252 = vsyncpa [#allocation3 + $0x1], 1 }
  0xf9   :  { %253 = vsyncpa [#allocation6], 1 }
  0xfa   :  { %255 = vsyncpa [#allocation6 + $0x1], 1 }
  0xfb   :  { %256 = vsyncpa [#allocation4], 1 }
  0xfc   :  { %258 = vsyncpa [#allocation4 + $0x1], 1 }

</bundles_post_ra>
